<compile_context>
chip_gen: v7x
topology: tpu7x:2x2x1
jax: 0.10.0
libtpu: 0.0.40
codegen_flags: <defaults>
</compile_context>

<pallas_src>
import jax
import jax.numpy as jnp
from jax.experimental import pallas as pl
from jax.experimental.pallas import tpu as pltpu

_LANES = 128        # vreg lane width
_SUBLANES = 8       # f32 vreg sublane height
_BLOCK_ROWS = 4096  # 4096 x 128 f32 = 2 MiB per buffer (v5e-safe with dbl-buf)


def _scale_shift_kernel(wb_ref, x_ref, o_ref):
    """y = x * w + b on one lane-dense (block_rows, 128) tile.

    wb_ref is a length-2 f32 SMEM vector [w, b]; x_ref / o_ref are VMEM tiles
    in the caller's dtype.  Compute is done in f32 registers; the narrow
    dtype is only used for the HBM<->VMEM stream (halves bytes for bf16).
    """
    x = x_ref[...].astype(jnp.float32)
    o_ref[...] = (x * wb_ref[0] + wb_ref[1]).astype(o_ref.dtype)


def _sublane_quantum(dtype) -> int:
    """Second-minor block quantum for this dtype (8 for f32, 16 for bf16, ...)."""
    itemsize = jnp.dtype(dtype).itemsize
    return _SUBLANES * max(1, 4 // itemsize)


def _choose_block_rows(rows: int, quantum: int) -> int:
    """Pick a block height: <= _BLOCK_ROWS, multiple of `quantum`, and sized so
    the row grid gets an even number of >= 2 steps when the input allows it
    (keeps both v7x TensorCores busy and amortizes per-step overhead)."""
    if rows <= quantum:
        return rows  # single full-extent block (allowed even if not a multiple)
    target_steps = max(2, pl.cdiv(rows, _BLOCK_ROWS))
    if target_steps % 2:
        target_steps += 1
    block_rows = pl.cdiv(pl.cdiv(rows, target_steps), quantum) * quantum
    return max(quantum, min(block_rows, _BLOCK_ROWS))


def _affine_jnp(x, weight, bias):
    """Fused plain-jnp fallback (XLA fuses this at the same HBM roofline)."""
    w = weight.reshape(()).astype(jnp.float32)
    b = bias.reshape(()).astype(jnp.float32)
    return (x.astype(jnp.float32) * w + b).astype(x.dtype)


def linear11_pallas(x, weight, bias):
    """nn.Linear(1, 1) semantics via Pallas for lane-aligned inputs.

    x: any shape whose element count is a multiple of 128 (the usual [N, 1]
    batch with N % 128 == 0).  Output has x's shape and dtype.
    """
    orig_shape = x.shape
    n = int(x.size)

    # TODO(synk): a masked store on the last tile could absorb a <128-element
    # lane tail in-kernel; for now non-aligned/empty inputs use the fused-jnp
    # path (no pad/slice HBM round trips either way).
    if n == 0 or n % _LANES != 0:
        return _affine_jnp(x, weight, bias)

    rows = n // _LANES
    quantum = _sublane_quantum(x.dtype)
    block_rows = _choose_block_rows(rows, quantum)
    grid_steps = pl.cdiv(rows, block_rows)

    # Free, contiguous reshape to a lane-dense slab: every vreg carries 128
    # useful elements and all stores are unmasked (except the grid-edge tile).
    x2d = x.reshape(rows, _LANES)

    # Pack weight & bias into one tiny 1-D SMEM vector (pads to 8 bytes).
    wb = jnp.concatenate([weight.reshape(-1), bias.reshape(-1)]).astype(jnp.float32)

    itemsize = jnp.dtype(x.dtype).itemsize
    out2d = pl.pallas_call(
        _scale_shift_kernel,
        out_shape=jax.ShapeDtypeStruct((rows, _LANES), x.dtype),
        grid=(grid_steps,),
        in_specs=[
            pl.BlockSpec(memory_space=pltpu.SMEM),                  # [w, b]
            pl.BlockSpec((block_rows, _LANES), lambda i: (i, 0)),   # x tile
        ],
        out_specs=pl.BlockSpec((block_rows, _LANES), lambda i: (i, 0)),
        compiler_params=pltpu.CompilerParams(
            dimension_semantics=("parallel",),
        ),
        cost_estimate=pl.CostEstimate(
            flops=2 * n,
            transcendentals=0,
            bytes_accessed=2 * n * itemsize,
        ),
    )(wb, x2d)

    # Contiguous reshape back to the caller's shape (free).
    return out2d.reshape(orig_shape)


def linear11(x, weight, bias, *, min_pallas_elems=1 << 21):
    """Dispatch: tiny or non-lane-aligned inputs use the fused plain-jnp affine
    (no launch overhead, XLA fuses into neighbors); large aligned inputs use
    the zero-copy Pallas streaming kernel."""
    n = int(x.size)
    if n < min_pallas_elems or n % _LANES != 0:
        return _affine_jnp(x, weight, bias)
    return linear11_pallas(x, weight, bias)


def mock_model_forward(*input_, **kwargs):
    """Exact semantics of MockModel.forward: ignore all inputs, return None."""
    # TODO(synk): forward() performs no computation; the Linear(1,1) kernel
    # above exercises the module's only parameterized sub-layer (`self.field`).
    return None


if __name__ == "__main__":
    key = jax.random.PRNGKey(0)
    kw, kb, kx, kx2, kx3 = jax.random.split(key, 5)

    # Deterministic parameters for nn.Linear(1, 1): weight [1, 1], bias [1].
    weight = jax.random.uniform(kw, (1, 1), jnp.float32, -1.0, 1.0)
    bias = jax.random.uniform(kb, (1,), jnp.float32, -1.0, 1.0)

    # Lane-aligned f32 batch: rows=24 -> block_rows=16, a 2-step "parallel"
    # grid with a masked partial trailing row-block.
    x = jax.random.normal(kx, (3072, 1), jnp.float32)
    y = jax.block_until_ready(linear11_pallas(x, weight, bias))
    y_ref = x @ weight.T + bias
    assert jnp.allclose(y, y_ref, atol=1e-6), "f32 Pallas path mismatch"

    # bf16 batch: narrow dtype streams through HBM; conversion happens
    # in-kernel.  rows=32 -> (16, 128) bf16 blocks, 2-step grid.
    x_bf = jax.random.normal(kx2, (4096, 1), jnp.float32).astype(jnp.bfloat16)
    y_bf = jax.block_until_ready(linear11_pallas(x_bf, weight, bias))
    y_bf_ref = (x_bf.astype(jnp.float32) * weight[0, 0] + bias[0]).astype(jnp.bfloat16)
    assert jnp.allclose(
        y_bf.astype(jnp.float32), y_bf_ref.astype(jnp.float32), atol=1e-2
    ), "bf16 Pallas path mismatch"

    # Tiny batch consistent with Linear(1, 1): goes through the fused-jnp
    # dispatch path (a Pallas launch would be pure overhead here).
    x_small = jax.random.normal(kx3, (2, 1), jnp.float32)
    y_small = jax.block_until_ready(linear11(x_small, weight, bias))
    y_small_ref = x_small @ weight.T + bias
    assert jnp.allclose(y_small, y_small_ref, atol=1e-6), "small-path mismatch"

    # Reproduce MockModel.forward exactly: it ignores inputs and returns None.
    assert mock_model_forward(x_small) is None

    print("KERNEL_OK")
</pallas_src>

<mosaic_0001>
module attributes {stable_mosaic.version = 11 : i64} {
  func.func @_scale_shift_kernel(%arg0: i32, %arg1: memref<2xf32, #tpu.memory_space<smem>>, %arg2: memref<16x128xf32, #tpu.memory_space<vmem>>, %arg3: memref<16x128xf32, #tpu.memory_space<vmem>>) attributes {dimension_semantics = [#tpu.dimension_semantics<parallel>], iteration_bounds = array<i64: 2>, scalar_prefetch = 0 : i64, scratch_operands = 0 : i64, tpu.core_type = #tpu.core_type<tc>, window_params = [{transform_indices = @transform_0, window_bounds = array<i64: 2>}, {transform_indices = @transform_1, window_bounds = array<i64: 16, 128>}, {transform_indices = @transform_2, window_bounds = array<i64: 16, 128>}]} {
    %c0 = arith.constant 0 : index
    %c0_0 = arith.constant 0 : index
    %0 = vector.load %arg2[%c0, %c0_0] : memref<16x128xf32, #tpu.memory_space<vmem>>, vector<16x128xf32>
    %c0_1 = arith.constant 0 : index
    %1 = memref.load %arg1[%c0_1] : memref<2xf32, #tpu.memory_space<smem>>
    %2 = vector.broadcast %1 : f32 to vector<16x128xf32>
    %3 = arith.mulf %0, %2 : vector<16x128xf32>
    %c1 = arith.constant 1 : index
    %4 = memref.load %arg1[%c1] : memref<2xf32, #tpu.memory_space<smem>>
    %5 = vector.broadcast %4 : f32 to vector<16x128xf32>
    %6 = arith.addf %3, %5 : vector<16x128xf32>
    %c0_2 = arith.constant 0 : index
    %c0_3 = arith.constant 0 : index
    %7 = vector.load %arg3[%c0_2, %c0_3] : memref<16x128xf32, #tpu.memory_space<vmem>>, vector<16x128xf32>
    tpu.vector_store %arg3[%c0_2, %c0_3], %6 {strides = array<i32>} : memref<16x128xf32, #tpu.memory_space<vmem>>, vector<16x128xf32>,
    return
  }
  func.func @transform_0(%arg0: i32) -> i32 {
    %c0_i32 = arith.constant 0 : i32
    %c0_i32_0 = arith.constant 0 : i32
    return %c0_i32 : i32
  }
  func.func @transform_1(%arg0: i32) -> (i32, i32) {
    %c0_i32 = arith.constant 0 : i32
    %c0_i32_0 = arith.constant 0 : i32
    return %arg0, %c0_i32 : i32, i32
  }
  func.func @transform_2(%arg0: i32) -> (i32, i32) {
    %c0_i32 = arith.constant 0 : i32
    %c0_i32_0 = arith.constant 0 : i32
    return %arg0, %c0_i32 : i32, i32
  }
}

</mosaic_0001>

<bundles_post_ra>
// kernel: tpu_custom_call.1
= control target key start
LH: loop header
LB: loop body
LE: loop exit
PB: predicated region body
PF: predicated region fallthrough
CT: control target
= control target key end

     0   :  { %7 = vsyncpa [#allocation5], 0  ;;  %s727_s0 = inlined_call_operand.hbm [shape: f32[2], index: 0, kind: input, shape index: {}]   ;;  %s728_s1 = inlined_call_operand.hbm [shape: f32[24,128], index: 1, kind: input, shape index: {}]   ;;  %s729_s2 = inlined_call_operand.hbm [shape: f32[24,128], index: 2, kind: output, shape index: {}]  }
   0x1   :  { %8 = vsyncpa [#allocation3], 0 }
   0x2   :  { %10 = vsyncpa [#allocation3 + $0x1], 0 }
   0x3   :  { %11 = vsyncpa [#allocation4], 0 }
   0x4   :  { %13 = vsyncpa [#allocation4 + $0x1], 0  ;;  %s523_s9 = smov 0   ;;  %s525_s10 = smov 0  }
   0x5   :  { %s527_s11 = smov 0   ;;  %s529_s12 = smov 0  }
   0x6 LB: > { %s544_s13 = sadd.s32 4294967295, %s499_s12   ;;  %s307_s14 = sadd.s32 4294967294, %s499_s12   ;;  %s499_s12 = sphi %s529_s12, %s745_s12   ;;  %s495_s11 = sphi %s527_s11, %s744_s11   ;;  %s491_s10 = sphi %s525_s10, %s743_s10   ;;  %s487_s9 = sphi %s523_s9, %s742_s9  }
   0x7   : > { %s548_s15 = sadd.s32 1, %s499_s12   ;;  %s47_s16 = sadd.s32 1, %s495_s11 }
   0x8   : > { %s44_s17 = ssub.s32 %s499_s12, %s548_s15  ;;  %p54_p0 = scmp.ne.s32.totalorder %s495_s11, %s491_s10 }
   0x9   : > { %p45_p1 = scmp.eq.s32.totalorder %s44_s17, 0  ;;  %p55_p2 = scmp.eq.s32.totalorder %s499_s12, 0 }
   0xa   : > { %p60_p3 = scmp.ne.s32.totalorder %s491_s10, %s487_s9  ;;  %p731_p4 = scmp.eq.s32.totalorder %s544_s13, 0 }
   0xb   : > { %s560_s18 = scalar_select %p45_p1, %s495_s11, %s47_s16  }
   0xc   : > { %p562_p5 = por %p55_p2, %p54_p0  ;;  %p568_p6 = por %p731_p4, %p60_p3 }
   0xd   : > { %p84_p7 = scmp.eq.s32.totalorder %s544_s13, 1  ;;  %p90_p8 = scmp.eq.s32.totalorder %s307_s14, 1 }
   0xe   : > { %p308_p9 = scmp.ge.s32.totalorder %s499_s12, 1  ;;  %p97_p10 = scmp.lt.s32.totalorder %s499_s12, 3 }
   0xf   : > { %p575_p11 = por %p84_p7, %p54_p0  ;;  %p579_p12 = por %p90_p8, %p60_p3 }
  0x10   : > { %p583_p13 = pnand %p308_p9, %p97_p10  ;;  %s388_s26 = scalar_lea.hbm %s727_s0, 16 }
  0x11   : > { %s734_s21 = scalar_select %p575_p11, 1, 0 }
  0x12   : > { %s735_s22 = scalar_select %p579_p12, 1, 0 }
  0x13   : > { %p340_p1 = pneg %p583_p13  ;;  %p389_p0 = scmp.ne.s32.totalorder %s727_s0, %s388_s26 }
  0x14   : > { %p395_p9 = scmp.lt.u32.totalorder %s388_s26, %s727_s0 }
  0x15   : > { %p341_p2 = pnand %p340_p1, %p731_p4 }
  0x17   : > { %p390_p3 = pneg %p341_p2 }
  0x19   : > { %p391_p7 = pnand %p390_p3, %p389_p0 }
  0x1b   : > { %p392_p8 = pneg %p391_p7 }
  0x1d   : > { %p397_p10 = pnand %p395_p9, %p392_p8 }
  0x1f   : > { %400 = shalt.err (!%p397_p10)
}
  0x20   : > { %s501_s3 = smov [#allocation2]   ;;  %p730_p1 = scmp.ge.s32.totalorder %s499_s12, 2 }
  0x21   : > { %343 = dma.hbm_to_smem (!%p341_p2), %s727_s0, 16, %s501_s3, [#allocation5]  }
  0x22   : > { %115 = sbr.rel (%p730_p1) target bundleno = 76 (0x4c), region = 20 }
  0x29   : > { %118 = sbr.rel (!%p562_p5) target bundleno = 76 (0x4c), region = 24  ;;  %s119_s6 = sand.u32 (%p562_p5), 1, %s495_s11  }
  0x2a   : > { %s312_s7 = sshll.u32 (%p562_p5), %s499_s12, 1  ;;  %s311_s8 = sshll.u32 (%p562_p5), %s119_s6, 4 }
  0x2b   : > { %s125_s14 = ssub.s32 (%p562_p5), 3, %s312_s7  ;;  %s613_s24 = scalar_lea.sflag (%p562_p5), [#allocation3], %s119_s6 }
  0x2c   : > { %p126_p0 = scmp.lt.s32.totalorder (%p562_p5), %s125_s14, 2  ;;  %s123_s25 = scalar_lea.vmem (%p562_p5), [#allocation6], %s311_s8 }
  0x30   : > { %s747_s14 = smov (!%p126_p0, %s125_s14), 2 }
  0x31   : > { %s610_s16 = sshll.u32 %s747_s14, 7 }
  0x32   : > { %s130_s17 = ssub.s32 256, %s610_s16 }
  0x33   : > { %131 = vsyncadd %s613_s24, %s130_s17  ;;  %p314_p5 = scmp.ne.s32.totalorder %s610_s16, 0  ;;  %s332_s19 = sshll.u32 %s499_s12, 8 }
  0x34   : > { %s621_s28 = scalar_lea.hbm %s728_s1, %s332_s19  ;;  %s136_s29 = sshll.u32 %s123_s25, 4  ;;  %s623_s29 = int_to_ptr.vmem [resolvable:$true] %s136_s29 }
  0x35   : > { %s401_s30 = scalar_lea.hbm %s621_s28, %s610_s16  ;;  %s405_s5 = scalar_lea.hbm %s728_s1, 384 }
  0x36   : > { %p402_p2 = scmp.ne.s32.totalorder %s621_s28, %s401_s30  ;;  %p406_p8 = scmp.lt.u32.totalorder %s621_s28, %s728_s1 }
  0x37   : > { %p407_p9 = scmp.lt.u32.totalorder %s405_s5, %s401_s30  ;;  %p409_p0 = scmp.lt.u32.totalorder %s401_s30, %s621_s28 }
  0x38   : > { %p403_p3 = pnand %p402_p2, %p314_p5 }
  0x39   : > { %p408_p10 = por %p407_p9, %p406_p8 }
  0x3a   : > { %p404_p7 = pneg %p403_p3 }
  0x3b   : > { %p410_p1 = por %p409_p0, %p408_p10 }
  0x3d   : > { %p411_p4 = pnand %p410_p1, %p404_p7 }
  0x3f   : > { %414 = shalt.err (!%p411_p4)
}
  0x40   : > { %s415_s8 = scalar_lea.vmem %s623_s29, %s610_s16  ;;  %s502_s14 = smov [#allocation6]  }
  0x41   : > { %p416_p2 = scmp.ne.s32.totalorder %s623_s29, %s415_s8  ;;  %s419_s17 = sshll.u32 %s502_s14, 4  ;;  %s420_s17 = int_to_ptr.vmem [resolvable:$false] %s419_s17 }
  0x42   : > { %s421_s25 = scalar_lea.vmem %s420_s17, 512  ;;  %p422_p11 = scmp.lt.s32.totalorder %s623_s29, %s420_s17 }
  0x43   : > { %p417_p3 = pnand %p416_p2, %p314_p5  ;;  %p423_p8 = scmp.lt.s32.totalorder %s421_s25, %s415_s8 }
  0x45   : > { %p418_p12 = pneg %p417_p3  ;;  %p424_p9 = por %p423_p8, %p422_p11 }
  0x47   : > { %p425_p10 = pnand %p424_p9, %p418_p12 }
  0x49   : > { %428 = shalt.err (!%p425_p10)
}
  0x4a   : > { %s503_s19 = smov 128   ;;  %s504_s26 = smov 8  }
  0x4b   : > { %142 = dma.hbm_to_vmem [thread:$0]  (%p314_p5), %s621_s28, %s610_s16, %s623_s29, %s613_s24, %s503_s19, %s503_s19, %s504_s26  }
  0x4c PF: > { %148 = sbr.rel (%p583_p13) target bundleno = 130 (0x82), region = 28  ;;  %p737_p4 = scmp.eq.s32.totalorder (!%p583_p13), %s544_s13, 0 }
  0x53   : > { %474 = dma.done.wait (%p737_p4), [#allocation5], 16   ;;  %p738_p11 = pmov %p737_p4 }
  0x54   : > { %s657_s27 = sand.u32 1, %s491_s10  }
  0x55   : > { %476 = vsyncadd (%p738_p11), [#allocation5], 4294967280  ;;  %s320_s30 = sshll.u32 %s657_s27, 4  ;;  %s155_s3 = scalar_lea.sflag [#allocation3], %s657_s27 }
  0x56   : > { %s158_s16 = scalar_lea.vmem [#allocation6], %s320_s30 }
  0x57   : > { %478 = dma.done.wait (%p568_p6), %s155_s3, 256  }
  0x58   : > { %480 = vsyncadd (%p568_p6), %s155_s3, 4294967040 }
  0x59   : > { %163 = sfence }
  0x5a   : > { %s192_s23 = sld [smem:[#allocation2]]  ;;  %s322_s24 = sld [smem:[#allocation2 + $0x1]]  ;;  %v190_v0 = vld [vmem:[%s158_s16] sm:$0xff]  ;;  %v191_v1 = vld [vmem:[%s158_s16 + $0x8] sm:$0xff] }
  0x5b   : > { %s179_s28 = scalar_lea.vmem [#allocation7], %s320_s30  ;;  %s203_s29 = scalar_lea.sflag [#allocation4], %s657_s27 }
  0x5c   : > { %p739_p12 = scmp.ne.s32.totalorder %s734_s21, 0 }
  0x5d   : > { %s324_s20 = sshll.u32 (%p739_p12), %s544_s13, 1 }
  0x5e   : > { %s211_s4 = ssub.s32 (%p739_p12), 3, %s324_s20 }
  0x5f   : > { %209 = sbr.rel (!%p739_p12) target bundleno = 130 (0x82), region = 40  ;;  %p212_p6 = scmp.lt.s32.totalorder (%p739_p12), %s211_s4, 2 }
  0x60   : > { %v193_v2 = vstv %s192_s23  ;;  %v197_v4 = vstv %s322_s24 }
  0x61   : > { %v194_v3 = vmul.f32 %v193_v2, %v190_v0  ;;  %v195_v5 = vmul.f32 %v193_v2, %v191_v1 }
  0x63   : > { %v198_v6 = vadd.f32 %v197_v4, %v194_v3  ;;  %v199_v7 = vadd.f32 %v197_v4, %v195_v5 }
  0x65   : > { %200 = vst [vmem:[%s179_s28] sm:$0xff] %v198_v6  ;;  %201 = vst [vmem:[%s179_s28 + $0x8] sm:$0xff] %v199_v7 }
  0x66   : > { %s749_s4 = smov (!%p212_p6, %s211_s4), 2 }
  0x67   : > { %s669_s5 = sshll.u32 %s749_s4, 7 }
  0x68   : > { %s216_s6 = ssub.s32 256, %s669_s5 }
  0x69   : > { %217 = vsyncadd %s203_s29, %s216_s6  ;;  %p326_p13 = scmp.ne.s32.totalorder %s669_s5, 0  ;;  %s333_s7 = sshll.u32 %s544_s13, 8 }
  0x6a   : > { %s679_s14 = scalar_lea.hbm %s729_s2, %s333_s7  ;;  %s222_s17 = sshll.u32 %s179_s28, 4  ;;  %s681_s17 = int_to_ptr.vmem [resolvable:$true] %s222_s17 }
  0x6b   : > { %s429_s25 = scalar_lea.vmem %s681_s17, %s669_s5  ;;  %s505_s19 = smov [#allocation7]  }
  0x6c   : > { %p430_p1 = scmp.ne.s32.totalorder %s681_s17, %s429_s25  ;;  %s433_s26 = sshll.u32 %s505_s19, 4  ;;  %s434_s26 = int_to_ptr.vmem [resolvable:$false] %s433_s26 }
  0x6d   : > { %s435_s13 = scalar_lea.vmem %s434_s26, 512  ;;  %p436_p0 = scmp.lt.s32.totalorder %s681_s17, %s434_s26 }
  0x6e   : > { %p431_p5 = pnand %p430_p1, %p326_p13  ;;  %p437_p2 = scmp.lt.s32.totalorder %s435_s13, %s429_s25 }
  0x70   : > { %p432_p7 = pneg %p431_p5  ;;  %p438_p3 = por %p437_p2, %p436_p0 }
  0x72   : > { %p439_p8 = pnand %p438_p3, %p432_p7 }
  0x74   : > { %442 = shalt.err (!%p439_p8)
}
  0x75   : > { %s443_s30 = scalar_lea.hbm %s679_s14, %s669_s5  ;;  %s447_s23 = scalar_lea.hbm %s729_s2, 384 }
  0x76   : > { %p444_p9 = scmp.ne.s32.totalorder %s679_s14, %s443_s30  ;;  %p448_p11 = scmp.lt.u32.totalorder %s679_s14, %s729_s2 }
  0x77   : > { %p449_p12 = scmp.lt.u32.totalorder %s447_s23, %s443_s30  ;;  %p451_p1 = scmp.lt.u32.totalorder %s443_s30, %s679_s14 }
  0x78   : > { %p445_p10 = pnand %p444_p9, %p326_p13 }
  0x79   : > { %p450_p6 = por %p449_p12, %p448_p11 }
  0x7a   : > { %p446_p4 = pneg %p445_p10 }
  0x7b   : > { %p452_p5 = por %p451_p1, %p450_p6 }
  0x7d   : > { %p453_p7 = pnand %p452_p5, %p446_p4 }
  0x7f   : > { %456 = shalt.err (!%p453_p7)
}
  0x80   : > { %s506_s20 = smov 128   ;;  %s507_s4 = smov 8  }
  0x81   : > { %228 = dma.vmem_to_hbm [thread:$0]  (%p326_p13), %s681_s17, %s669_s5, %s679_s14, %s203_s29, %s506_s20, %s506_s20, %s507_s4  }
  0x82 PF: > { %s237_s6 = sand.u32 1, %s487_s9   ;;  %p740_p0 = scmp.ne.s32.totalorder %s735_s22, 0 }
  0x83   : > { %p741_p2 = scmp.ge.s32.totalorder %s499_s12, 2  ;;  %s238_s7 = scalar_lea.sflag [#allocation4], %s237_s6 }
  0x85   : > { %p345_p3 = pnand %p741_p2, %p740_p0 }
  0x87   : > { %482 = dma.done.wait (!%p345_p3), %s238_s7, 256  }
  0x88   : > { %484 = vsyncadd (!%p345_p3), %s238_s7, 4294967040  ;;  %p16_p8 = scmp.ge.s32.totalorder %s548_s15, 4   ;;  %s742_s9 = smov %s491_s10 }
  0x89   : > { %s743_s10 = smov %s495_s11  ;;  %s744_s11 = smov %s560_s18 }
  0x8a   : > { %s745_s12 = smov %s548_s15  ;;  %18 = sbr.rel (!%p16_p8) target bundleno = 6 (0x6), region = 78 }
  0x91   :  { %243 = vsyncpa [#allocation3], 1 }
  0x92   :  { %245 = vsyncpa [#allocation3 + $0x1], 1 }
  0x93   :  { %246 = vsyncpa [#allocation4], 1 }
  0x94   :  { %248 = vsyncpa [#allocation4 + $0x1], 1 }
  0x95   :  { %249 = vsyncpa [#allocation5], 1 }
  0x96   :  { %251 = vsyncpa [#allocation5 + $0x1], 1 }

</bundles_post_ra>
